<compile_context>
chip_gen: v6e
topology: v6e:2x2x1
jax: 0.10.0
libtpu: 0.0.40
codegen_flags: <defaults>
</compile_context>

<pallas_src>
import functools

import jax
import jax.numpy as jnp
from jax import lax
from jax.experimental import pallas as pl
from jax.experimental.pallas import tpu as pltpu


# ---------------------------------------------------------------------------
# Tiling helper
# ---------------------------------------------------------------------------
def _pick_tile(dim, quantum, cap):
    """Largest tile <= cap that is a multiple of `quantum` and divides `dim` evenly.

    Falls back to the full dimension (always legal for TPU block shapes).
    """
    if dim % quantum != 0:
        return dim
    t = (min(cap, dim) // quantum) * quantum
    while t >= quantum:
        if dim % t == 0:
            return t
        t -= quantum
    return dim


# ---------------------------------------------------------------------------
# Pass 1: weighted per-channel sums  (training mode only)
# ---------------------------------------------------------------------------
def _wbn_stats_kernel(w_ref, x_ref, s1_ref, s2_ref):
    """Accumulate s1[c] += w[n]*sum(x), s2[c] += w[n]*sum(x*x) over (n, hw) tiles.

    w_ref  : [N]        f32 in SMEM (per-sample weights)
    x_ref  : [TC, THW]  input dtype (batch dim squeezed by BlockSpec)
    s1_ref : [TC, 1]    f32 accumulator (VMEM-resident across the reduction axes)
    s2_ref : [TC, 1]    f32 accumulator
    """
    n = pl.program_id(1)

    @pl.when((pl.program_id(1) == 0) & (pl.program_id(2) == 0))
    def _init():
        s1_ref[...] = jnp.zeros_like(s1_ref)
        s2_ref[...] = jnp.zeros_like(s2_ref)

    x = x_ref[...].astype(jnp.float32)                     # upcast in-register
    wn = w_ref[n]                                          # scalar from SMEM
    s1_ref[...] += wn * jnp.sum(x, axis=1, keepdims=True)
    s2_ref[...] += wn * jnp.sum(x * x, axis=1, keepdims=True)


# ---------------------------------------------------------------------------
# Pass 2: fused normalize  y = x * a_c + b_c
# ---------------------------------------------------------------------------
def _wbn_norm_kernel(x_ref, a_ref, b_ref, y_ref):
    """x_ref/y_ref: [TC, THW] (batch squeezed); a_ref/b_ref: [TC, 1] f32."""
    x = x_ref[...].astype(jnp.float32)
    y_ref[...] = (x * a_ref[...] + b_ref[...]).astype(y_ref.dtype)


# ---------------------------------------------------------------------------
# Functional forward
# ---------------------------------------------------------------------------
def wbn_forward(x, w, gamma=None, beta=None, running_mean=None, running_var=None,
                *, training=True, momentum=0.1, eps=1e-5):
    """x: [N, C, H, W], w: [N]. Returns (y, new_running_mean, new_running_var)."""
    N, C, H, W = x.shape
    HW = H * W
    x3 = x.reshape(N, C, HW)                 # free reshape, no transpose
    wf = w.astype(jnp.float32)

    TC = _pick_tile(C, 8, 128)               # channel tile (sublanes)
    THW = _pick_tile(HW, 128, 2048)          # spatial tile (lanes)
    grid = (C // TC, N, HW // THW)

    x_spec = pl.BlockSpec((None, TC, THW), lambda c, n, h: (n, c, h))
    cvec_spec = pl.BlockSpec((TC, 1), lambda c, n, h: (c, 0))

    if training:
        # ---- pass 1: weighted per-channel sums -------------------------------
        s1, s2 = pl.pallas_call(
            _wbn_stats_kernel,
            grid=grid,
            in_specs=[
                pl.BlockSpec(memory_space=pltpu.MemorySpace.SMEM),   # w[N]
                x_spec,
            ],
            out_specs=(cvec_spec, cvec_spec),
            out_shape=(jax.ShapeDtypeStruct((C, 1), jnp.float32),
                       jax.ShapeDtypeStruct((C, 1), jnp.float32)),
            compiler_params=pltpu.CompilerParams(
                dimension_semantics=("parallel", "arbitrary", "arbitrary")),
        )(wf, x3)

        inv_wsum = 1.0 / (float(HW) * jnp.sum(wf))
        bmean = s1[:, 0] * inv_wsum
        bvar = jnp.maximum(s2[:, 0] * inv_wsum - bmean * bmean, 0.0)

        mean, var = bmean, bvar
        # TODO(synk): original CUDA `wbn` body is not shown; running_var is updated
        # with the (biased) weighted batch variance here.
        new_rm = (1.0 - momentum) * running_mean + momentum * bmean
        new_rv = (1.0 - momentum) * running_var + momentum * bvar
    else:
        mean = running_mean.astype(jnp.float32)
        var = running_var.astype(jnp.float32)
        new_rm, new_rv = running_mean, running_var

    # ---- fold normalization into one FMA per element -------------------------
    g = (gamma if gamma is not None else jnp.ones((C,), jnp.float32)).astype(jnp.float32)
    b = (beta if beta is not None else jnp.zeros((C,), jnp.float32)).astype(jnp.float32)
    a_c = g * lax.rsqrt(var + eps)
    b_c = b - a_c * mean

    # ---- pass 2: y = x * a + b ------------------------------------------------
    y3 = pl.pallas_call(
        _wbn_norm_kernel,
        grid=grid,
        in_specs=[x_spec, cvec_spec, cvec_spec],
        out_specs=x_spec,
        out_shape=jax.ShapeDtypeStruct((N, C, HW), x.dtype),
        compiler_params=pltpu.CompilerParams(
            dimension_semantics=("parallel", "parallel", "arbitrary")),
    )(x3, a_c.reshape(C, 1), b_c.reshape(C, 1))

    return y3.reshape(N, C, H, W), new_rm, new_rv


# ---------------------------------------------------------------------------
# Module-like wrapper (mirror of the PyTorch WBN module, deterministic init)
# ---------------------------------------------------------------------------
class WBNPallas:
    def __init__(self, num_features, eps=1e-5, momentum=0.1, affine=False):
        self.num_features = num_features
        self.eps = eps
        self.momentum = momentum
        self.affine = affine
        self.training = True
        if affine:
            self.weight = jnp.ones((num_features,), jnp.float32)
            self.bias = jnp.zeros((num_features,), jnp.float32)
        else:
            self.weight = None
            self.bias = None
        self.running_mean = jnp.zeros((num_features,), jnp.float32)
        self.running_var = jnp.ones((num_features,), jnp.float32)

    def __call__(self, x, w):
        y, new_rm, new_rv = wbn_forward(
            x, w, self.weight, self.bias, self.running_mean, self.running_var,
            training=self.training, momentum=self.momentum, eps=self.eps)
        if self.training:
            self.running_mean, self.running_var = new_rm, new_rv
        return y


# ---------------------------------------------------------------------------
# Pure-jnp reference (training mode, affine=False) for validation
# ---------------------------------------------------------------------------
def _reference_wbn(x, w, eps):
    N, C, H, W = x.shape
    wf = jnp.repeat(w, H * W).reshape(N, 1, H, W)
    wsum = jnp.sum(wf)
    mean = jnp.sum(x * wf, axis=(0, 2, 3)) / wsum
    diff = x - mean[None, :, None, None]
    var = jnp.sum(wf * diff * diff, axis=(0, 2, 3)) / wsum
    return diff / jnp.sqrt(var[None, :, None, None] + eps)


if __name__ == "__main__":
    key = jax.random.PRNGKey(0)
    kx, kw = jax.random.split(key)

    N, C, H, W = 2, 4, 16, 16
    x = jax.random.normal(kx, (N, C, H, W), dtype=jnp.float32)
    w = jax.random.uniform(kw, (N,), dtype=jnp.float32) + 0.5   # positive sample weights

    # training-mode path (two-pass: stats + normalize)
    mod = WBNPallas(num_features=C, eps=1e-5, momentum=0.1, affine=False)
    y = jax.block_until_ready(mod(x, w))

    y_ref = _reference_wbn(x, w, 1e-5)
    assert y.shape == x.shape and y.dtype == x.dtype
    assert float(jnp.max(jnp.abs(y - y_ref))) < 1e-4

    # eval-mode path (stats pass skipped; running_mean=0, running_var=1)
    mod_eval = WBNPallas(num_features=C, eps=1e-5, momentum=0.1, affine=False)
    mod_eval.training = False
    y_eval = jax.block_until_ready(mod_eval(x, w))
    y_eval_ref = x / jnp.sqrt(1.0 + 1e-5)
    assert float(jnp.max(jnp.abs(y_eval - y_eval_ref))) < 1e-4

    print("KERNEL_OK")
</pallas_src>

<mosaic_0001>
module attributes {stable_mosaic.version = 11 : i64} {
  func.func @_wbn_stats_kernel(%arg0: i32, %arg1: i32, %arg2: i32, %arg3: memref<2xf32, #tpu.memory_space<smem>>, %arg4: memref<1x4x256xf32, #tpu.memory_space<vmem>>, %arg5: memref<4x1xf32, #tpu.memory_space<vmem>>, %arg6: memref<4x1xf32, #tpu.memory_space<vmem>>) attributes {dimension_semantics = [#tpu.dimension_semantics<parallel>, #tpu.dimension_semantics<arbitrary>, #tpu.dimension_semantics<arbitrary>], iteration_bounds = array<i64: 1, 2, 1>, scalar_prefetch = 0 : i64, scratch_operands = 0 : i64, tpu.core_type = #tpu.core_type<tc>, window_params = [{transform_indices = @transform_0, window_bounds = array<i64: 2>}, {transform_indices = @transform_1, window_bounds = array<i64: 1, 4, 256>}, {transform_indices = @transform_2, window_bounds = array<i64: 4, 1>}, {transform_indices = @transform_3, window_bounds = array<i64: 4, 1>}]} {
    %c0_i32 = arith.constant 0 : i32
    %0 = arith.cmpi eq, %arg1, %c0_i32 : i32
    %c0_i32_0 = arith.constant 0 : i32
    %1 = arith.cmpi eq, %arg2, %c0_i32_0 : i32
    %2 = arith.andi %0, %1 : i1
    %3 = arith.extui %2 : i1 to i32
    %c0_i32_1 = arith.constant 0 : i32
    %4 = arith.cmpi ne, %3, %c0_i32_1 : i32
    scf.if %4 {
      %cst_13 = arith.constant 0.000000e+00 : f32
      %24 = vector.broadcast %cst_13 : f32 to vector<4x1xf32>
      %c0_14 = arith.constant 0 : index
      %c0_15 = arith.constant 0 : index
      %25 = vector.load %arg5[%c0_14, %c0_15] : memref<4x1xf32, #tpu.memory_space<vmem>>, vector<4x1xf32>
      tpu.vector_store %arg5[%c0_14, %c0_15], %24 {strides = array<i32>} : memref<4x1xf32, #tpu.memory_space<vmem>>, vector<4x1xf32>,
      %cst_16 = arith.constant 0.000000e+00 : f32
      %26 = vector.broadcast %cst_16 : f32 to vector<4x1xf32>
      %c0_17 = arith.constant 0 : index
      %c0_18 = arith.constant 0 : index
      %27 = vector.load %arg6[%c0_17, %c0_18] : memref<4x1xf32, #tpu.memory_space<vmem>>, vector<4x1xf32>
      tpu.vector_store %arg6[%c0_17, %c0_18], %26 {strides = array<i32>} : memref<4x1xf32, #tpu.memory_space<vmem>>, vector<4x1xf32>,
    } else {
    }
    %c0 = arith.constant 0 : index
    %c0_2 = arith.constant 0 : index
    %c0_3 = arith.constant 0 : index
    %5 = vector.load %arg4[%c0, %c0_2, %c0_3] : memref<1x4x256xf32, #tpu.memory_space<vmem>>, vector<1x4x256xf32>
    %6 = vector.shape_cast %5 : vector<1x4x256xf32> to vector<4x256xf32>
    %7 = arith.index_cast %arg1 : i32 to index
    %8 = memref.load %arg3[%7] : memref<2xf32, #tpu.memory_space<smem>>
    %c0_4 = arith.constant 0 : index
    %c0_5 = arith.constant 0 : index
    %9 = vector.load %arg5[%c0_4, %c0_5] : memref<4x1xf32, #tpu.memory_space<vmem>>, vector<4x1xf32>
    %cst = arith.constant dense<0.000000e+00> : vector<4xf32>
    %10 = vector.multi_reduction <add>, %6, %cst [1] : vector<4x256xf32> to vector<4xf32>
    %11 = vector.shape_cast %10 : vector<4xf32> to vector<4x1xf32>
    %12 = vector.broadcast %8 : f32 to vector<4x1xf32>
    %13 = arith.mulf %12, %11 : vector<4x1xf32>
    %14 = arith.addf %9, %13 : vector<4x1xf32>
    %c0_6 = arith.constant 0 : index
    %c0_7 = arith.constant 0 : index
    %15 = vector.load %arg5[%c0_6, %c0_7] : memref<4x1xf32, #tpu.memory_space<vmem>>, vector<4x1xf32>
    tpu.vector_store %arg5[%c0_6, %c0_7], %14 {strides = array<i32>} : memref<4x1xf32, #tpu.memory_space<vmem>>, vector<4x1xf32>,
    %c0_8 = arith.constant 0 : index
    %c0_9 = arith.constant 0 : index
    %16 = vector.load %arg6[%c0_8, %c0_9] : memref<4x1xf32, #tpu.memory_space<vmem>>, vector<4x1xf32>
    %17 = arith.mulf %6, %6 : vector<4x256xf32>
    %cst_10 = arith.constant dense<0.000000e+00> : vector<4xf32>
    %18 = vector.multi_reduction <add>, %17, %cst_10 [1] : vector<4x256xf32> to vector<4xf32>
    %19 = vector.shape_cast %18 : vector<4xf32> to vector<4x1xf32>
    %20 = vector.broadcast %8 : f32 to vector<4x1xf32>
    %21 = arith.mulf %20, %19 : vector<4x1xf32>
    %22 = arith.addf %16, %21 : vector<4x1xf32>
    %c0_11 = arith.constant 0 : index
    %c0_12 = arith.constant 0 : index
    %23 = vector.load %arg6[%c0_11, %c0_12] : memref<4x1xf32, #tpu.memory_space<vmem>>, vector<4x1xf32>
    tpu.vector_store %arg6[%c0_11, %c0_12], %22 {strides = array<i32>} : memref<4x1xf32, #tpu.memory_space<vmem>>, vector<4x1xf32>,
    return
  }
  func.func @transform_0(%arg0: i32, %arg1: i32, %arg2: i32) -> i32 {
    %c0_i32 = arith.constant 0 : i32
    %c0_i32_0 = arith.constant 0 : i32
    return %c0_i32 : i32
  }
  func.func @transform_1(%arg0: i32, %arg1: i32, %arg2: i32) -> (i32, i32, i32) {
    %c0_i32 = arith.constant 0 : i32
    return %arg1, %arg0, %arg2 : i32, i32, i32
  }
  func.func @transform_2(%arg0: i32, %arg1: i32, %arg2: i32) -> (i32, i32) {
    %c0_i32 = arith.constant 0 : i32
    %c0_i32_0 = arith.constant 0 : i32
    return %arg0, %c0_i32 : i32, i32
  }
  func.func @transform_3(%arg0: i32, %arg1: i32, %arg2: i32) -> (i32, i32) {
    %c0_i32 = arith.constant 0 : i32
    %c0_i32_0 = arith.constant 0 : i32
    return %arg0, %c0_i32 : i32, i32
  }
}

</mosaic_0001>

<bundles_post_ra>
// kernel: tpu_custom_call.1
= control target key start
LH: loop header
LB: loop body
LE: loop exit
PB: predicated region body
PF: predicated region fallthrough
CT: control target
= control target key end

     0   :  { %9 = vsyncpa [#allocation4], 0  ;;  %s726_s0 = inlined_call_operand.hbm [shape: f32[2], index: 0, kind: input, shape index: {}]   ;;  %s727_s1 = inlined_call_operand.hbm [shape: f32[2,4,256], index: 1, kind: input, shape index: {}]   ;;  %s728_s2 = inlined_call_operand.vmem [shape: f32[4,1], index: 2, kind: output, shape index: {0}]   ;;  %s729_s3 = inlined_call_operand.vmem [shape: f32[4,1], index: 3, kind: output, shape index: {1}]  }
   0x1   :  { %10 = vsyncpa [#allocation3], 0 }
   0x2   :  { %12 = vsyncpa [#allocation3 + $0x1], 0  ;;  %s598_s12 = smov 0   ;;  %s600_s13 = smov 0  }
   0x3   :  { %s602_s14 = smov 0   ;;  %s604_s15 = smov 0  }
   0x4   :  { %s606_s16 = smov 0   ;;  %s608_s17 = smov 0  }
   0x5 LB: > { %s395_s18 = sadd.s32 4294967295, %s573_s17   ;;  %p82_p0 = scmp.ne.s32.totalorder %s557_s13, %s553_s12  ;;  %s573_s17 = sphi %s608_s17, %s18_s17   ;;  %s569_s16 = sphi %s606_s16, %s738_s16   ;;  %s565_s15 = sphi %s604_s15, %s737_s15   ;;  %s561_s14 = sphi %s602_s14, %s736_s14   ;;  %s557_s13 = sphi %s600_s13, %s735_s13   ;;  %s553_s12 = sphi %s598_s12, %s734_s12  }
   0x6   : > { %p628_p1 = scmp.eq.s32.totalorder %s395_s18, 0  ;;  %p396_p2 = scmp.ge.s32.totalorder %s573_s17, 1 }
   0x7   : > { %p145_p3 = scmp.lt.s32.totalorder %s573_s17, 3  ;;  %s33_s22 = sadd.s32 1, %s569_s16 }
   0x8   : > { %p636_p4 = por %p628_p1, %p82_p0  ;;  %p35_p8 = scmp.ge.s32.totalorder %s33_s22, 2 }
   0x9   : > { %p640_p5 = pnand %p396_p2, %p145_p3  ;;  %s69_s23 = sadd.s32 1, %s561_s14 }
   0xa   : > { %p76_p9 = scmp.ne.s32.totalorder %s561_s14, %s557_s13  ;;  %p77_p10 = scmp.eq.s32.totalorder %s573_s17, 0 }
   0xb   : > { %p418_p6 = pneg %p640_p5  ;;  %s575_s24 = smov [#allocation2]  }
   0xc   : > { %s740_s22 = smov (%p35_p8, %s33_s22), 0  ;;  %p78_p11 = por %p77_p10, %p76_p9 }
   0xd   : > { %p419_p7 = pnand %p418_p6, %p628_p1  ;;  %p427_p12 = scmp.lt.s32.totalorder %s573_s17, 2 }
   0xe   : > { %s62_s27 = ssub.s32 %s569_s16, %s740_s22  ;;  %s167_s28 = sand.u32 1, %s561_s14  }
   0xf   : > { %421 = dma.hbm_to_smem (!%p419_p7), %s726_s0, 16, %s575_s24, [#allocation4]  }
  0x10   : > { %p67_p13 = scmp.eq.s32.totalorder %s62_s27, 0  ;;  %s399_s29 = sshll.u32 %s167_s28, 3 }
  0x11   : > { %s410_s30 = sshll.u32 %s569_s16, 7  ;;  %s171_s8 = scalar_lea.vmem [#allocation5], %s399_s29 }
  0x12   : > { %s664_s4 = scalar_select %p67_p13, %s561_s14, %s69_s23  }
  0x13   : > { %s181_s7 = scalar_lea.hbm %s727_s1, %s410_s30  ;;  %s183_s9 = sshll.u32 %s171_s8, 4  ;;  %s184_s9 = int_to_ptr.vmem [resolvable:$true] %s183_s9 }
  0x14   : > { %p669_p0 = pnand %p427_p12, %p78_p11  ;;  %s168_s11 = scalar_lea.sflag [#allocation3], %s167_s28 }
  0x15   : > { %s504_s12 = scalar_lea.vmem %s184_s9, 128  ;;  %s576_s18 = smov [#allocation5]  }
  0x16   : > { %p493_p2 = pneg %p669_p0  ;;  %p505_p3 = scmp.ne.s32.totalorder %s184_s9, %s504_s12 }
  0x17   : > { %s509_s23 = sshll.u32 %s576_s18, 4  ;;  %s510_s23 = int_to_ptr.vmem [resolvable:$false] %s509_s23 }
  0x18   : > { %p507_p6 = pnand %p505_p3, %p493_p2  ;;  %s511_s24 = scalar_lea.vmem %s510_s23, 256 }
  0x19   : > { %p512_p8 = scmp.lt.s32.totalorder %s184_s9, %s510_s23  ;;  %p513_p9 = scmp.lt.s32.totalorder %s511_s24, %s504_s12 }
  0x1a   : > { %p508_p7 = pneg %p507_p6 }
  0x1b   : > { %p514_p10 = por %p513_p9, %p512_p8 }
  0x1d   : > { %p515_p11 = pnand %p514_p10, %p508_p7 }
  0x1f   : > { %518 = shalt.err (!%p515_p11)
}
  0x20   : > { %425 = dma.hbm_to_vmem [thread:$0]  (!%p669_p0), %s181_s7, 128, %s184_s9, %s168_s11  }
  0x21   : > { %192 = sbr.rel (%p640_p5) target bundleno = 205 (0xcd), region = 28 }
  0x26   : > { %544 = dma.done.wait (%p628_p1), [#allocation4], 16  }
  0x27   : > { %546 = vsyncadd (%p628_p1), [#allocation4], 4294967280  ;;  %s198_s25 = sand.u32 1, %s557_s13  }
  0x28   : > { %s404_s26 = sshll.u32 %s198_s25, 3  ;;  %s199_s27 = scalar_lea.sflag [#allocation3], %s198_s25 }
  0x29   : > { %s202_s28 = scalar_lea.vmem [#allocation5], %s404_s26 }
  0x2a   : > { %548 = dma.done.wait (%p636_p4), %s199_s27, 128  }
  0x2b   : > { %550 = vsyncadd (%p636_p4), %s199_s27, 4294967168 }
  0x2c   : > { %207 = sfence }
  0x2d   : > { %p238_p5 = scmp.eq.s32.totalorder %s565_s15, 0 }
  0x2e   : > { %vm244_vm0 = vcmask (%p238_p5), 3072   ;;  %v577_v0 = vmov (%p238_p5), 0.0  }
  0x2f   : > { %243 = sbr.rel (!%p238_p5) target bundleno = 52 (0x34), region = 40  ;;  %245 = vst.msk [vmem:[%s728_s2] sm:$0xf] (%p238_p5), %vm244_vm0, %v577_v0  ;;  %246 = vst.msk [vmem:[%s729_s3] sm:$0xf] (%p238_p5), %vm244_vm0, %v577_v0 }
  0x34 PF: > { %v247_v1 = vld [vmem:[%s202_s28] sm:$0xff]  ;;  %vm253_vm1 = vcmask 1043456   ;;  %s248_s20 = sld [smem:[#allocation2 + %s565_s15]]  ;;  %vm262_vm2 = vcmask 3072  }
  0x35   : > { %v251_v2 = vcombine.high %v247_v1, %v247_v1  ;;  %v254_v3 = vsel %vm253_vm1, %v247_v1, 0.0  ;;  %v265_v4 = vmul.f32 %v247_v1, %v247_v1 }
  0x36   : > { %v249_v12 = vld [vmem:[%s728_s2] sm:$0xf] }
  0x37   : > { %v255_v5 = vsel %vm253_vm1, %v251_v2, 0.0  ;;  %v267_v6 = vcombine.high %v265_v4, %v265_v4  ;;  %v269_v7 = vsel %vm253_vm1, %v265_v4, 0.0  ;;  %v264_v16 = vld [vmem:[%s729_s3] sm:$0xf] }
  0x38   : > { %v256_v8 = vadd.f32 %v255_v5, %v254_v3 }
  0x39   : > { %v270_v9 = vsel %vm253_vm1, %v267_v6, 0.0 }
  0x3a   : > { %257 = vadd.xlane.f32.xlu0 %v256_v8  ;;  %v271_v10 = vadd.f32 %v270_v9, %v269_v7  ;;  %v259_v11 = vstv %s248_s20 }
  0x3e   : > { %272 = vadd.xlane.f32.xlu0 %v271_v10 }
  0xc3   : > { %v258_v13 = vpop.xlane.xlu0 %257 }
  0xc4   : > { %v260_v14 = vmul.f32 %v259_v11, %v258_v13 }
  0xc6   : > { %v261_v15 = vadd.f32 %v260_v14, %v249_v12 }
  0xc7   : > { %v273_v17 = vpop.xlane.xlu0 %272 }
  0xc8   : > { %263 = vst.msk [vmem:[%s728_s2] sm:$0xf] %vm262_vm2, %v261_v15  ;;  %v274_v18 = vmul.f32 %v273_v17, %v259_v11 }
  0xca   : > { %v275_v19 = vadd.f32 %v274_v18, %v264_v16 }
  0xcc   : > { %276 = vst.msk [vmem:[%s729_s3] sm:$0xf] %vm262_vm2, %v275_v19 }
  0xcd PF: > { %s18_s17 = sadd.s32 1, %s573_s17   ;;  %s734_s12 = smov %s557_s13 }
  0xce   : > { %p15_p1 = scmp.ge.s32.totalorder %s18_s17, 4   ;;  %s735_s13 = smov %s561_s14 }
  0xcf   : > { %s736_s14 = smov %s664_s4  ;;  %s737_s15 = smov %s569_s16 }
  0xd0   : > { %s738_s16 = smov %s740_s22  ;;  %17 = sbr.rel (!%p15_p1) target bundleno = 5 (0x5), region = 89 }
  0xd5   :  { %310 = vsyncpa [#allocation3], 1 }
  0xd6   :  { %312 = vsyncpa [#allocation3 + $0x1], 1 }
  0xd7   :  { %313 = vsyncpa [#allocation4], 1 }
  0xd8   :  { %315 = vsyncpa [#allocation4 + $0x1], 1 }

</bundles_post_ra>
